<compile_context>
chip_gen: v6e
topology: v6e:2x2x1
jax: 0.10.0
libtpu: 0.0.40
codegen_flags: <defaults>
</compile_context>

<pallas_src>
import functools

import jax
import jax.numpy as jnp
from jax.experimental import pallas as pl
from jax.experimental.pallas import tpu as pltpu


def _round_up(n, m):
    return -(-n // m) * m


def _doa_mapper_kernel(w_ref, x_ref, shift_ref, o_ref):
    # w_ref:     (C_out, C_in)          BN-scale-folded 1x1 conv weights (resident)
    # x_ref:     (Bblk, C_in, tile_px)  pixels on the lane axis
    # shift_ref: (C_out, 1)             fused conv-bias + BN shift (resident, f32)
    # o_ref:     (Bblk, C_out, tile_px)
    w = w_ref[...]
    shift = shift_ref[...]
    for b in range(x_ref.shape[0]):          # Bblk is small & static -> unrolled
        y = jnp.dot(w, x_ref[b], preferred_element_type=jnp.float32)
        o_ref[b] = jnp.maximum(y + shift, 0.0).astype(o_ref.dtype)


def _choose_tile_px(m128, cap):
    """Largest lane tile <= cap that keeps padding of the 128-rounded pixel axis tiny."""
    cap = max(128, (cap // 128) * 128)
    if m128 <= cap:
        return m128, m128                           # one tile per batch row, zero waste
    cands = [(_round_up(m128, t), t) for t in range(128, cap + 1, 128)]
    min_total = min(total for total, _ in cands)
    # allow up to ~3% extra padding if it buys a much bigger tile
    budget = min_total + max(128, (int(0.03 * min_total) // 128) * 128)
    tile = max(t for total, t in cands if total <= budget)
    return tile, _round_up(m128, tile)


def _choose_batch_block(B, n_px_tiles, per_batch_step_bytes,
                        target_bytes=1 << 20, vmem_budget=24 << 20):
    """Smallest divisor of B whose block reaches ~1 MiB/step, keeping >= 2 grid steps."""
    best = 1
    for bb in range(1, B + 1):
        if B % bb:
            continue
        if 2 * bb * per_batch_step_bytes > vmem_budget:   # double-buffered in+out tiles
            break
        steps = (B // bb) * n_px_tiles
        if steps < 2 and B * n_px_tiles >= 2:
            continue              # don't collapse a shardable grid to a single step
        best = bb
        if bb * per_batch_step_bytes >= target_bytes:
            break                 # smallest block that reaches the per-step DMA target
    return best


def _fused_conv_bn_relu(x_bcm, w_scaled, shift, *, out_dtype, tile_px_max=16384):
    """Fused 1x1 conv + folded BN + ReLU.  x_bcm: (B, C_in, M) -> (B, C_out, M)."""
    B, C_in, M = x_bcm.shape
    C_out = w_scaled.shape[0]
    dsize = jnp.dtype(x_bcm.dtype).itemsize

    # ---- Tiling: lane (pixel) tile + optional batch block ------------------------
    m128 = _round_up(M, 128)
    tile_px, M_pad = _choose_tile_px(m128, tile_px_max)
    n_px_tiles = M_pad // tile_px
    per_batch_step_bytes = (C_in + C_out) * tile_px * dsize
    bb = _choose_batch_block(B, n_px_tiles, per_batch_step_bytes)

    # ---- Pad pixel axis only when T*F is not 128-aligned / tail is ragged --------
    # TODO(synk): handle the ragged tail in-kernel (masked lanes) to avoid the extra
    # HBM pad/slice passes when M % 128 != 0; for 128-aligned M this is a no-op.
    if M_pad != M:
        x_bcm = jnp.pad(x_bcm, ((0, 0), (0, 0), (0, M_pad - M)))

    grid = (B // bb, n_px_tiles)

    tile_bytes = bb * per_batch_step_bytes
    vmem_limit = int(min(max(3 * tile_bytes + (2 << 20), 32 << 20), 48 << 20))
    cost = pl.CostEstimate(
        flops=2 * B * C_out * C_in * M_pad,
        transcendentals=0,
        bytes_accessed=int(B * (C_in + C_out) * M_pad * dsize + C_out * (C_in + 1) * 4),
    )

    y = pl.pallas_call(
        _doa_mapper_kernel,
        out_shape=jax.ShapeDtypeStruct((B, C_out, M_pad), out_dtype),
        grid=grid,
        in_specs=[
            pl.BlockSpec((C_out, C_in), lambda bi, i: (0, 0)),            # weights
            pl.BlockSpec((bb, C_in, tile_px), lambda bi, i: (bi, 0, i)),  # x tile
            pl.BlockSpec((C_out, 1), lambda bi, i: (0, 0)),               # shift
        ],
        out_specs=pl.BlockSpec((bb, C_out, tile_px), lambda bi, i: (bi, 0, i)),
        compiler_params=pltpu.CompilerParams(
            dimension_semantics=("parallel", "parallel"),
            vmem_limit_bytes=vmem_limit,
        ),
        cost_estimate=cost,
    )(w_scaled, x_bcm, shift)

    if M_pad != M:
        y = y[:, :, :M]
    return y


def doa_mapper_forward(x, params, *, n_doa, tfd_factor, tile_px_max=16384):
    """x: (B, n_in_feat, T, F) NCHW.  Returns (B, tfd_factor*F, T, n_doa)."""
    B, C_in, T, F = x.shape
    conv_w = params["conv_w"]          # (C_out, C_in) -- 1x1 kernel squeezed
    conv_b = params["conv_b"]          # (C_out,)
    gamma = params["bn_gamma"]         # (C_out,)
    beta = params["bn_beta"]           # (C_out,)
    mean = params["bn_mean"]           # (C_out,)
    var = params["bn_var"]             # (C_out,)
    eps = 1e-5
    C_out = conv_w.shape[0]

    # Fold BN (eval mode) into the conv: scale -> weights, shift stays per-channel.
    scale = gamma / jnp.sqrt(var + eps)                                     # (C_out,)
    w_scaled = (conv_w.astype(jnp.float32) * scale.astype(jnp.float32)[:, None])
    w_scaled = w_scaled.astype(x.dtype)     # match activation dtype (bf16-ready MXU path)
    shift = (beta + scale * (conv_b - mean)).reshape(C_out, 1).astype(jnp.float32)

    # NCHW is already (B, C_in, T*F)-contiguous: pure reshape, no transpose pass.
    x_flat = x.reshape(B, C_in, T * F)
    y = _fused_conv_bn_relu(
        x_flat, w_scaled, shift, out_dtype=x.dtype, tile_px_max=tile_px_max
    )                                                          # (B, C_out, T*F)
    y = y.reshape(B, C_out, T, F)                              # NCHW conv output

    # Epilogue: the module's reshape/permute (pure layout glue, done by XLA).
    # TODO(synk): fold this permute into the downstream consumer's input indexing /
    # Pallas in_specs instead of a separate HBM transpose pass (writing the final
    # layout directly from this kernel would make the last dim n_doa=8 lane-sparse).
    y = y.reshape(B, tfd_factor, n_doa, T, F)
    y = jnp.transpose(y, (0, 1, 4, 3, 2))                      # (B, tfd, F, T, n_doa)
    y = y.reshape(B, tfd_factor * F, T, n_doa)
    return y


def doa_mapper_reference(x, params, *, n_doa, tfd_factor):
    """Pure-JAX reference mirroring the PyTorch forward (BN eval mode)."""
    conv_w, conv_b = params["conv_w"], params["conv_b"]
    gamma, beta = params["bn_gamma"], params["bn_beta"]
    mean, var = params["bn_mean"], params["bn_var"]
    eps = 1e-5
    # 1x1 conv (NCHW): out[b,o,t,f] = sum_c W[o,c] * x[b,c,t,f] + b[o]
    y = jnp.einsum("oc,bctf->botf", conv_w, x)
    y = y + conv_b[None, :, None, None]
    y = (y - mean[None, :, None, None]) / jnp.sqrt(var[None, :, None, None] + eps)
    y = y * gamma[None, :, None, None] + beta[None, :, None, None]
    y = jnp.maximum(y, 0.0)
    B, C, T, F = y.shape
    y = y.reshape(B, tfd_factor, n_doa, T, F)
    y = jnp.transpose(y, (0, 1, 4, 3, 2))
    y = y.reshape(B, tfd_factor * F, T, n_doa)
    return y


if __name__ == "__main__":
    # Small shapes consistent with the module.
    B = 2
    n_in_feat = 4
    T = 16          # time frames   (conv H)
    n_freq = 16     # freq bins     (conv W)
    n_doa = 8
    tfd_factor = 2
    C_out = tfd_factor * n_doa

    key = jax.random.PRNGKey(0)
    kx, kw, kb, kg, kbeta, km, kv = jax.random.split(key, 7)

    x = jax.random.normal(kx, (B, n_in_feat, T, n_freq), dtype=jnp.float32)

    params = {
        "conv_w": jax.random.normal(kw, (C_out, n_in_feat), dtype=jnp.float32) * 0.1,
        "conv_b": jax.random.normal(kb, (C_out,), dtype=jnp.float32) * 0.1,
        "bn_gamma": 1.0 + 0.1 * jax.random.normal(kg, (C_out,), dtype=jnp.float32),
        "bn_beta": 0.1 * jax.random.normal(kbeta, (C_out,), dtype=jnp.float32),
        "bn_mean": 0.05 * jax.random.normal(km, (C_out,), dtype=jnp.float32),
        "bn_var": 1.0 + 0.1 * jnp.abs(jax.random.normal(kv, (C_out,), dtype=jnp.float32)),
    }

    fwd = jax.jit(functools.partial(doa_mapper_forward, n_doa=n_doa, tfd_factor=tfd_factor))
    out = fwd(x, params)
    out = jax.block_until_ready(out)

    ref = doa_mapper_reference(x, params, n_doa=n_doa, tfd_factor=tfd_factor)
    assert out.shape == (B, tfd_factor * n_freq, T, n_doa), out.shape
    assert jnp.allclose(out, ref, atol=2e-5, rtol=2e-5), "mismatch vs reference"

    print("KERNEL_OK")
</pallas_src>

<mosaic_0001>
module attributes {stable_mosaic.version = 11 : i64} {
  func.func @_doa_mapper_kernel(%arg0: i32, %arg1: i32, %arg2: memref<16x4xf32, #tpu.memory_space<vmem>>, %arg3: memref<1x4x256xf32, #tpu.memory_space<vmem>>, %arg4: memref<16x1xf32, #tpu.memory_space<vmem>>, %arg5: memref<1x16x256xf32, #tpu.memory_space<vmem>>) attributes {dimension_semantics = [#tpu.dimension_semantics<parallel>, #tpu.dimension_semantics<parallel>], iteration_bounds = array<i64: 2, 1>, scalar_prefetch = 0 : i64, scratch_operands = 0 : i64, tpu.core_type = #tpu.core_type<tc>, window_params = [{pipeline_mode = #tpu.pipeline_mode<synchronous>, transform_indices = @transform_0, window_bounds = array<i64: 16, 4>}, {transform_indices = @transform_1, window_bounds = array<i64: 1, 4, 256>}, {pipeline_mode = #tpu.pipeline_mode<synchronous>, transform_indices = @transform_2, window_bounds = array<i64: 16, 1>}, {transform_indices = @transform_3, window_bounds = array<i64: 1, 16, 256>}]} {
    %c0 = arith.constant 0 : index
    %c0_0 = arith.constant 0 : index
    %0 = vector.load %arg2[%c0, %c0_0] : memref<16x4xf32, #tpu.memory_space<vmem>>, vector<16x4xf32>
    %c0_1 = arith.constant 0 : index
    %c0_2 = arith.constant 0 : index
    %1 = vector.load %arg4[%c0_1, %c0_2] : memref<16x1xf32, #tpu.memory_space<vmem>>, vector<16x1xf32>
    %c0_3 = arith.constant 0 : index
    %c0_4 = arith.constant 0 : index
    %c0_5 = arith.constant 0 : index
    %2 = vector.load %arg3[%c0_3, %c0_4, %c0_5] : memref<1x4x256xf32, #tpu.memory_space<vmem>>, vector<1x4x256xf32>
    %3 = vector.shape_cast %2 : vector<1x4x256xf32> to vector<4x256xf32>
    %cst = arith.constant dense<0.000000e+00> : vector<16x256xf32>
    %4 = tpu.matmul %0, %3, %cst {dimension_numbers = #tpu.dot_dimension_numbers<[1], [0], [0], [1], [0, 0, 1, 1], [], []>} : vector<16x4xf32>, vector<4x256xf32>, vector<16x256xf32> -> vector<16x256xf32>
    %5 = vector.broadcast %1 : vector<16x1xf32> to vector<16x256xf32>
    %6 = arith.addf %4, %5 : vector<16x256xf32>
    %cst_6 = arith.constant 0.000000e+00 : f32
    %7 = vector.broadcast %cst_6 : f32 to vector<16x256xf32>
    %8 = arith.maximumf %6, %7 : vector<16x256xf32>
    %c0_7 = arith.constant 0 : index
    %c0_8 = arith.constant 0 : index
    %c0_9 = arith.constant 0 : index
    %9 = vector.load %arg5[%c0_7, %c0_8, %c0_9] : memref<1x16x256xf32, #tpu.memory_space<vmem>>, vector<1x16x256xf32>
    %10 = vector.shape_cast %9 : vector<1x16x256xf32> to vector<16x256xf32>
    %11 = vector.shape_cast %8 : vector<16x256xf32> to vector<1x16x256xf32>
    tpu.vector_store %arg5[%c0_7, %c0_8, %c0_9], %11 {strides = array<i32>} : memref<1x16x256xf32, #tpu.memory_space<vmem>>, vector<1x16x256xf32>,
    return
  }
  func.func @transform_0(%arg0: i32, %arg1: i32) -> (i32, i32) {
    %c0_i32 = arith.constant 0 : i32
    %c0_i32_0 = arith.constant 0 : i32
    %c0_i32_1 = arith.constant 0 : i32
    return %c0_i32, %c0_i32_0 : i32, i32
  }
  func.func @transform_1(%arg0: i32, %arg1: i32) -> (i32, i32, i32) {
    %c0_i32 = arith.constant 0 : i32
    %c0_i32_0 = arith.constant 0 : i32
    return %arg0, %c0_i32, %arg1 : i32, i32, i32
  }
  func.func @transform_2(%arg0: i32, %arg1: i32) -> (i32, i32) {
    %c0_i32 = arith.constant 0 : i32
    %c0_i32_0 = arith.constant 0 : i32
    %c0_i32_1 = arith.constant 0 : i32
    return %c0_i32, %c0_i32_0 : i32, i32
  }
  func.func @transform_3(%arg0: i32, %arg1: i32) -> (i32, i32, i32) {
    %c0_i32 = arith.constant 0 : i32
    %c0_i32_0 = arith.constant 0 : i32
    return %arg0, %c0_i32, %arg1 : i32, i32, i32
  }
}

</mosaic_0001>

<bundles_post_ra>
// kernel: doa_mapper_forward.1
= control target key start
LH: loop header
LB: loop body
LE: loop exit
PB: predicated region body
PF: predicated region fallthrough
CT: control target
= control target key end

     0   :  { %s504_s12 = smov 0   ;;  %s506_s13 = smov 0   ;;  %s549_s0 = inlined_call_operand.vmem [shape: f32[16,4], index: 0, kind: input, shape index: {}]   ;;  %s550_s1 = inlined_call_operand.vmem [shape: f32[2,4,256], index: 1, kind: input, shape index: {}]   ;;  %s551_s2 = inlined_call_operand.vmem [shape: f32[16,1], index: 2, kind: input, shape index: {}]   ;;  %s552_s3 = inlined_call_operand.vmem [shape: f32[2,16,256], index: 3, kind: output, shape index: {}]  }
   0x1   :  { %s508_s14 = smov 0  }
   0x2 LB: > { %s25_s15 = sadd.s32 1, %s476_s13  ;;  %p415_p0 = scmp.ge.s32.totalorder %s480_s14, 1  ;;  %s480_s14 = sphi %s508_s14, %s13_s14   ;;  %s476_s13 = sphi %s506_s13, %s554_s13   ;;  %s472_s12 = sphi %s504_s12, %s553_s12  }
   0x3   : > { %p27_p1 = scmp.ge.s32.totalorder %s25_s15, 2  ;;  %p158_p2 = scmp.lt.s32.totalorder %s480_s14, 3 }
   0x5   : > { %s556_s15 = smov (%p27_p1, %s25_s15), 0  ;;  %p159_p3 = pnand %p415_p0, %p158_p2 }
   0x6   : > { %p191_p4 = scmp.lt.s32.totalorder (!%p159_p3), %s472_s12, 1 }
   0x7   : > { %162 = sbr.rel (%p159_p3) target bundleno = 221 (0xdd), region = 32 }
   0xc   : > { %v482_v0 = vmov 0.0   ;;  %v212_v1 = vld [vmem:[%s551_s2] sm:$0xff]  ;;  %s558_s12 = smov (!%p191_p4, %s472_s12), 1  ;;  %v483_v2 = vmov 0   ;;  %v213_v3 = vld [vmem:[%s551_s2 + $0x8] sm:$0xff]  ;;  %vm234_vm0 = vcmask 1043456  }
   0xd   : > { %303 = vmatprep.mubr.f32.mxu0 %v482_v0  ;;  %309 = vmatprep.mubr.f32.mxu1 %v482_v0  ;;  %s426_s18 = sshll.u32 %s558_s12, 3  ;;  %v210_v6 = vld [vmem:[%s549_s0] sm:$0xff]  ;;  %vm227_vm1 = vcmask 31744   ;;  %v211_v7 = vld [vmem:[%s549_s0 + $0x8] sm:$0xff]  ;;  %s427_s28 = sshll.u32 %s558_s12, 5 }
   0xe   : > { %456 = vset.pattern.permute.xlu0 %v483_v2  ;;  %s198_s23 = scalar_lea.vmem %s550_s1, %s426_s18  ;;  %s208_s4 = scalar_lea.vmem %s552_s3, %s427_s28 }
   0xf   : > { %217 = vperm.xlu0 %456, %v212_v1   ;;  %v214_v4 = vld [vmem:[%s198_s23] sm:$0xff] }
  0x10   : > { %v226_v5 = vcombine.high %v214_v4, %v214_v4 }
  0x12   : > { %420 = vmatprep.subr.msk.mxu0 %vm234_vm0, %v226_v5  ;;  %428 = vmatprep.subr.msk.mxu1 %vm234_vm0, %v226_v5 }
  0x13   : > { %222 = vperm.xlu0 %456, %v213_v3   ;;  %421 = vmatpush1.msk.msra.mxu0 %vm234_vm0, %v214_v4 }
  0x14   : > { %429 = vmatpush1.msk.msra.mxu1 %vm234_vm0, %v214_v4  ;;  %422 = vmatmul.mubr.msk.f32.vlgmr.msra.gmra.mxu0 %vm227_vm1, %v210_v6 }
  0x15   : > { %423 = vmatmul.mubr.msk.f32.vlgmr.msra.gmra.mxu1 %vm227_vm1, %v211_v7 }
  0x8a   : > { %v218_v8 = vpop.permute.xlu0 %217 }
  0x8e   : > { %v223_v9 = vpop.permute.xlu0 %222 }
  0xd4   : > { %v305_v10 = vpop.f32.mrf.mxu0 }
  0xd5   : > { %v311_v11 = vpop.f32.mrf.mxu1  ;;  %v306_v12 = vadd.f32 %v305_v10, %v218_v8 }
  0xd6   : > { %v312_v13 = vadd.f32 %v311_v11, %v223_v9  ;;  %v307_v14 = vpop.f32.mrf.mxu0 }
  0xd7   : > { %v313_v15 = vpop.f32.mrf.mxu1  ;;  %v316_v16 = vmax.f32 %v306_v12, 0.0  ;;  %v308_v18 = vadd.f32 %v307_v14, %v218_v8 }
  0xd8   : > { %v318_v17 = vmax.f32 %v312_v13, 0.0  ;;  %v314_v19 = vadd.f32 %v313_v15, %v223_v9 }
  0xd9   : > { %320 = vst [vmem:[%s208_s4] sm:$0xff] %v316_v16  ;;  %v317_v20 = vmax.f32 %v308_v18, 0.0 }
  0xda   : > { %322 = vst [vmem:[%s208_s4 + $0x10] sm:$0xff] %v318_v17  ;;  %v319_v21 = vmax.f32 %v314_v19, 0.0 }
  0xdb   : > { %321 = vst [vmem:[%s208_s4 + $0x8] sm:$0xff] %v317_v20 }
  0xdc   : > { %323 = vst [vmem:[%s208_s4 + $0x18] sm:$0xff] %v319_v21 }
  0xdd PF: > { %s13_s14 = sadd.s32 1, %s480_s14   ;;  %s553_s12 = smov %s476_s13 }
  0xde   : > { %p10_p5 = scmp.ge.s32.totalorder %s13_s14, 4   ;;  %s554_s13 = smov %s556_s15 }
  0xe0   :  { %12 = sbr.rel (!%p10_p5) target bundleno = 2 (0x2), region = 62 }

</bundles_post_ra>
